<compile_context>
chip_gen: v6e
topology: v6e:2x2x1
jax: 0.10.0
libtpu: 0.0.40
codegen_flags: <defaults>
</compile_context>

<pallas_src>
import functools
import math

import jax
import jax.numpy as jnp
from jax.experimental import pallas as pl
from jax.experimental.pallas import tpu as pltpu


def _round_up(x, m):
    return ((x + m - 1) // m) * m


# ------------------------------- Pallas kernel ------------------------------ #

def _project_attention_kernel(img_ref, sq_ref, wi_ref, bi_ref, o_ref, *,
                              hidden_p, block_b, num_loc, dim_img):
    """Fused image GatedTanh -> joint*lc -> softmax over locations.

    img_ref : (Bt, L, Dimg)  image features for Bt batch rows
    sq_ref  : (Bt, Hp)       precomputed GatedTanh(question) * w_lc (zero padded)
    wi_ref  : (Dimg, 2*Hp)   fused [fc | gate] image weight, bf16, lane-aligned
    bi_ref  : (1, 2*Hp)      fused [fc | gate] image bias, f32
    o_ref   : (Bt, L)        softmaxed attention weights
    """
    # One big MXU matmul over Bt*L rows: bf16 operands, f32 accumulation.
    img = img_ref[...].reshape(block_b * num_loc, dim_img).astype(jnp.bfloat16)
    y = jnp.dot(img, wi_ref[...], preferred_element_type=jnp.float32) + bi_ref[...]

    # GatedTanh; the fc|gate halves are each padded to Hp (multiple of 128
    # lanes) so these slices are tile-aligned views.
    img_fa = jnp.tanh(y[:, :hidden_p]) * jax.nn.sigmoid(y[:, hidden_p:])  # (Bt*L, Hp)

    # joint_feature * lc (lc weight already folded into sq); Dropout = identity
    # (eval mode).  Lane-direction reduction -> (Bt, L), lane-dense.
    img_fa = img_fa.reshape(block_b, num_loc, hidden_p)
    raw = jnp.sum(img_fa * sq_ref[...][:, None, :], axis=-1)              # (Bt, L)

    # Softmax over the location axis; exact normalization.
    m = jnp.max(raw, axis=-1, keepdims=True)
    e = jnp.exp(raw - m)
    s = jnp.sum(e, axis=-1, keepdims=True)
    o_ref[...] = (e / s).astype(o_ref.dtype)


# -------------------------------- host wrapper ------------------------------ #

def project_attention(image_feat, question_embedding, params, *, hidden, block_b=8):
    B, L, Dimg = image_feat.shape
    hidden_p = params["wi_packed"].shape[1] // 2   # lane-aligned per-half width

    # ---- question branch hoisted out of the kernel (one tiny (B, Dtxt) matmul,
    # better done by XLA than as an M=1 MXU pass per grid step).
    q_fc = question_embedding @ params["wt_fc"] + params["bt_fc"]
    q_g = question_embedding @ params["wt_g"] + params["bt_g"]
    q_fa = jnp.tanh(q_fc) * jax.nn.sigmoid(q_g)
    scaled_q = q_fa * params["wlc"]                                   # fold lc weight
    scaled_q = jnp.pad(scaled_q, ((0, 0), (0, hidden_p - hidden)))    # (B, Hp), zero pad
    # (lc bias is dropped: it cancels in the softmax)

    # ---- batch tiling: Bt rows per grid step.  Bt is either the full batch or a
    # multiple of 8 (keeps the (Bt, Hp)/(Bt, L) sublane blocks legal); a partial
    # last block is masked on writeback.  On v7x, pick block_b so the grid has
    # >= 2 steps to feed both TensorCores.
    bt = B if B <= block_b else max(8, (block_b // 8) * 8)
    grid = (pl.cdiv(B, bt),)

    kernel = functools.partial(_project_attention_kernel, hidden_p=hidden_p,
                               block_b=bt, num_loc=L, dim_img=Dimg)

    def call(single_buffer_weights):
        # Constant-index_map weight blocks gain nothing from a second buffer;
        # single-buffering halves their VMEM footprint (important at production
        # Dimg/H on v7x's 64 MiB VMEM).
        wkw = {"pipeline_mode": pl.Buffered(1)} if single_buffer_weights else {}
        return pl.pallas_call(
            kernel,
            out_shape=jax.ShapeDtypeStruct((B, L), image_feat.dtype),
            grid=grid,
            in_specs=[
                pl.BlockSpec((bt, L, Dimg), lambda b: (b, 0, 0)),              # image rows
                pl.BlockSpec((bt, hidden_p), lambda b: (b, 0)),                # scaled question
                pl.BlockSpec((Dimg, 2 * hidden_p), lambda b: (0, 0), **wkw),   # fused W (resident)
                pl.BlockSpec((1, 2 * hidden_p), lambda b: (0, 0), **wkw),      # fused bias
            ],
            out_specs=pl.BlockSpec((bt, L), lambda b: (b, 0)),
            compiler_params=pltpu.CompilerParams(
                dimension_semantics=("parallel",),     # megacore split on v7x
                vmem_limit_bytes=32 * 1024 * 1024,     # >= v5e's 16 MiB default scope
            ),
        )(image_feat, scaled_q, params["wi_packed"], params["bi_packed"])

    try:
        att = call(True)
    except Exception:  # pl.Buffered / pipeline_mode unsupported -> default buffering
        att = call(False)

    # expand_as(image_feat) is a view in PyTorch — emit it as an XLA broadcast so
    # the kernel does not write B*L*Dimg bytes for only B*L distinct values.
    return jnp.broadcast_to(att[:, :, None], image_feat.shape)


# ---------------------------- parameter construction ------------------------ #

def init_params(key, image_feat_dim, txt_dim, hidden):
    """Raw per-layer f32 parameters, mimicking torch.nn.Linear init."""
    def linear(k, din, dout):
        bound = 1.0 / math.sqrt(din)
        kw, kb = jax.random.split(k)
        w = jax.random.uniform(kw, (din, dout), jnp.float32, -bound, bound)
        b = jax.random.uniform(kb, (dout,), jnp.float32, -bound, bound)
        return w, b

    ks = jax.random.split(key, 5)
    wi_fc, bi_fc = linear(ks[0], image_feat_dim, hidden)   # fa_image.fc
    wi_g, bi_g = linear(ks[1], image_feat_dim, hidden)     # fa_image.gate_fc
    wt_fc, bt_fc = linear(ks[2], txt_dim, hidden)          # fa_txt.fc
    wt_g, bt_g = linear(ks[3], txt_dim, hidden)            # fa_txt.gate_fc
    wlc, blc = linear(ks[4], hidden, 1)                    # lc
    return {"wi_fc": wi_fc, "bi_fc": bi_fc, "wi_g": wi_g, "bi_g": bi_g,
            "wt_fc": wt_fc, "bt_fc": bt_fc, "wt_g": wt_g, "bt_g": bt_g,
            "wlc": wlc[:, 0], "blc": blc[0]}


def pack_params(raw, hidden):
    """Kernel-side packing: fused [fc|gate] image weight, each half zero-padded to
    a multiple of 128 lanes, stored bf16 (bias stays f32)."""
    hidden_p = _round_up(hidden, 128)
    pad_w = lambda w: jnp.pad(w, ((0, 0), (0, hidden_p - hidden)))
    pad_b = lambda b: jnp.pad(b, (0, hidden_p - hidden))
    wi = jnp.concatenate([pad_w(raw["wi_fc"]), pad_w(raw["wi_g"])], axis=1)
    bi = jnp.concatenate([pad_b(raw["bi_fc"]), pad_b(raw["bi_g"])])[None, :]
    return {
        "wi_packed": wi.astype(jnp.bfloat16),   # (Dimg, 2*Hp) bf16 MXU operand
        "bi_packed": bi.astype(jnp.float32),    # (1, 2*Hp)
        "wt_fc": raw["wt_fc"], "bt_fc": raw["bt_fc"],   # question branch stays f32
        "wt_g": raw["wt_g"], "bt_g": raw["bt_g"],       # (evaluated in XLA)
        "wlc": raw["wlc"],
    }


# ------------------------------ pure-JAX reference --------------------------- #

def reference_forward(image_feat, question_embedding, raw, hidden):
    def gated_tanh(x, w_fc, b_fc, w_g, b_g):
        return jnp.tanh(x @ w_fc + b_fc) * jax.nn.sigmoid(x @ w_g + b_g)

    img_fa = gated_tanh(image_feat, raw["wi_fc"], raw["bi_fc"], raw["wi_g"], raw["bi_g"])
    q_fa = gated_tanh(question_embedding, raw["wt_fc"], raw["bt_fc"], raw["wt_g"], raw["bt_g"])
    joint = img_fa * q_fa[:, None, :]                         # dropout = identity (eval)
    raw_att = joint @ raw["wlc"][:, None] + raw["blc"]        # (B, L, 1)
    w = jax.nn.softmax(raw_att, axis=1)
    return jnp.broadcast_to(w, image_feat.shape)


# ----------------------------------- main ------------------------------------ #

if __name__ == "__main__":
    B, L = 2, 16
    IMAGE_FEAT_DIM, TXT_DIM, HIDDEN = 64, 48, 32

    root = jax.random.PRNGKey(0)
    k_img, k_txt, k_p = jax.random.split(root, 3)

    image_feat = jax.random.normal(k_img, (B, L, IMAGE_FEAT_DIM), jnp.float32)
    question_embedding = jax.random.normal(k_txt, (B, TXT_DIM), jnp.float32)

    raw = init_params(k_p, IMAGE_FEAT_DIM, TXT_DIM, HIDDEN)
    params = pack_params(raw, HIDDEN)

    out = project_attention(image_feat, question_embedding, params, hidden=HIDDEN)
    jax.block_until_ready(out)

    ref = reference_forward(image_feat, question_embedding, raw, HIDDEN)
    assert out.shape == image_feat.shape
    max_err = float(jnp.max(jnp.abs(out - ref)))
    assert max_err < 5e-3, f"max abs error {max_err}"
    print("KERNEL_OK")
</pallas_src>

<mosaic_0001>
module attributes {stable_mosaic.version = 11 : i64} {
  func.func @_project_attention_kernel(%arg0: i32, %arg1: memref<2x16x64xf32, #tpu.memory_space<vmem>>, %arg2: memref<2x128xf32, #tpu.memory_space<vmem>>, %arg3: memref<64x256xbf16, #tpu.memory_space<vmem>>, %arg4: memref<1x256xf32, #tpu.memory_space<vmem>>, %arg5: memref<2x16xf32, #tpu.memory_space<vmem>>) attributes {dimension_semantics = [#tpu.dimension_semantics<parallel>], iteration_bounds = array<i64: 1>, scalar_prefetch = 0 : i64, scratch_operands = 0 : i64, tpu.core_type = #tpu.core_type<tc>, window_params = [{transform_indices = @transform_0, window_bounds = array<i64: 2, 16, 64>}, {transform_indices = @transform_1, window_bounds = array<i64: 2, 128>}, {pipeline_mode = #tpu.pipeline_mode<synchronous>, transform_indices = @transform_2, window_bounds = array<i64: 64, 256>}, {pipeline_mode = #tpu.pipeline_mode<synchronous>, transform_indices = @transform_3, window_bounds = array<i64: 1, 256>}, {transform_indices = @transform_4, window_bounds = array<i64: 2, 16>}]} {
    %c0 = arith.constant 0 : index
    %c0_0 = arith.constant 0 : index
    %c0_1 = arith.constant 0 : index
    %0 = vector.load %arg1[%c0, %c0_0, %c0_1] : memref<2x16x64xf32, #tpu.memory_space<vmem>>, vector<2x16x64xf32>
    %1 = vector.shape_cast %0 : vector<2x16x64xf32> to vector<32x64xf32>
    %2 = arith.truncf %1 : vector<32x64xf32> to vector<32x64xbf16>
    %c0_2 = arith.constant 0 : index
    %c0_3 = arith.constant 0 : index
    %3 = vector.load %arg3[%c0_2, %c0_3] : memref<64x256xbf16, #tpu.memory_space<vmem>>, vector<64x256xbf16>
    %cst = arith.constant dense<0.000000e+00> : vector<32x256xf32>
    %4 = tpu.matmul %2, %3, %cst {dimension_numbers = #tpu.dot_dimension_numbers<[1], [0], [0], [1], [0, 0, 1, 1], [], []>} : vector<32x64xbf16>, vector<64x256xbf16>, vector<32x256xf32> -> vector<32x256xf32>
    %c0_4 = arith.constant 0 : index
    %c0_5 = arith.constant 0 : index
    %5 = vector.load %arg4[%c0_4, %c0_5] : memref<1x256xf32, #tpu.memory_space<vmem>>, vector<1x256xf32>
    %6 = vector.broadcast %5 : vector<1x256xf32> to vector<32x256xf32>
    %7 = arith.addf %4, %6 : vector<32x256xf32>
    %8 = vector.extract_strided_slice %7 {offsets = [0, 0], sizes = [32, 128], strides = [1, 1]} : vector<32x256xf32> to vector<32x128xf32>
    %9 = math.tanh %8 : vector<32x128xf32>
    %10 = vector.extract_strided_slice %7 {offsets = [0, 128], sizes = [32, 128], strides = [1, 1]} : vector<32x256xf32> to vector<32x128xf32>
    %11 = arith.negf %10 : vector<32x128xf32>
    %12 = math.exp %11 : vector<32x128xf32>
    %cst_6 = arith.constant 1.000000e+00 : f32
    %13 = vector.broadcast %cst_6 : f32 to vector<32x128xf32>
    %14 = arith.addf %13, %12 : vector<32x128xf32>
    %15 = arith.divf %13, %14 : vector<32x128xf32>
    %16 = arith.mulf %9, %15 : vector<32x128xf32>
    %17 = vector.shape_cast %16 : vector<32x128xf32> to vector<2x16x128xf32>
    %c0_7 = arith.constant 0 : index
    %c0_8 = arith.constant 0 : index
    %18 = vector.load %arg2[%c0_7, %c0_8] : memref<2x128xf32, #tpu.memory_space<vmem>>, vector<2x128xf32>
    %19 = vector.shape_cast %18 : vector<2x128xf32> to vector<2x1x128xf32>
    %20 = vector.broadcast %19 : vector<2x1x128xf32> to vector<2x16x128xf32>
    %21 = arith.mulf %17, %20 : vector<2x16x128xf32>
    %cst_9 = arith.constant dense<0.000000e+00> : vector<2x16xf32>
    %22 = vector.multi_reduction <add>, %21, %cst_9 [2] : vector<2x16x128xf32> to vector<2x16xf32>
    %cst_10 = arith.constant dense<0xFF800000> : vector<2xf32>
    %23 = vector.multi_reduction <maximumf>, %22, %cst_10 [1] : vector<2x16xf32> to vector<2xf32>
    %24 = vector.shape_cast %23 : vector<2xf32> to vector<2x1xf32>
    %25 = vector.broadcast %24 : vector<2x1xf32> to vector<2x16xf32>
    %26 = arith.subf %22, %25 : vector<2x16xf32>
    %27 = math.exp %26 : vector<2x16xf32>
    %cst_11 = arith.constant dense<0.000000e+00> : vector<2xf32>
    %28 = vector.multi_reduction <add>, %27, %cst_11 [1] : vector<2x16xf32> to vector<2xf32>
    %29 = vector.shape_cast %28 : vector<2xf32> to vector<2x1xf32>
    %30 = vector.broadcast %29 : vector<2x1xf32> to vector<2x16xf32>
    %31 = arith.divf %27, %30 : vector<2x16xf32>
    %c0_12 = arith.constant 0 : index
    %c0_13 = arith.constant 0 : index
    %32 = vector.load %arg5[%c0_12, %c0_13] : memref<2x16xf32, #tpu.memory_space<vmem>>, vector<2x16xf32>
    tpu.vector_store %arg5[%c0_12, %c0_13], %31 {strides = array<i32>} : memref<2x16xf32, #tpu.memory_space<vmem>>, vector<2x16xf32>,
    return
  }
  func.func @transform_0(%arg0: i32) -> (i32, i32, i32) {
    %c0_i32 = arith.constant 0 : i32
    %c0_i32_0 = arith.constant 0 : i32
    %c0_i32_1 = arith.constant 0 : i32
    return %arg0, %c0_i32, %c0_i32_0 : i32, i32, i32
  }
  func.func @transform_1(%arg0: i32) -> (i32, i32) {
    %c0_i32 = arith.constant 0 : i32
    %c0_i32_0 = arith.constant 0 : i32
    return %arg0, %c0_i32 : i32, i32
  }
  func.func @transform_2(%arg0: i32) -> (i32, i32) {
    %c0_i32 = arith.constant 0 : i32
    %c0_i32_0 = arith.constant 0 : i32
    %c0_i32_1 = arith.constant 0 : i32
    return %c0_i32, %c0_i32_0 : i32, i32
  }
  func.func @transform_3(%arg0: i32) -> (i32, i32) {
    %c0_i32 = arith.constant 0 : i32
    %c0_i32_0 = arith.constant 0 : i32
    %c0_i32_1 = arith.constant 0 : i32
    return %c0_i32, %c0_i32_0 : i32, i32
  }
  func.func @transform_4(%arg0: i32) -> (i32, i32) {
    %c0_i32 = arith.constant 0 : i32
    %c0_i32_0 = arith.constant 0 : i32
    return %arg0, %c0_i32 : i32, i32
  }
}

module attributes {stable_mosaic.version = 11 : i64} {
  func.func @_project_attention_kernel(%arg0: i32, %arg1: memref<2x16x64xf32, #tpu.memory_space<vmem>>, %arg2: memref<2x128xf32, #tpu.memory_space<vmem>>, %arg3: memref<64x256xbf16, #tpu.memory_space<vmem>>, %arg4: memref<1x256xf32, #tpu.memory_space<vmem>>, %arg5: memref<2x16xf32, #tpu.memory_space<vmem>>) attributes {dimension_semantics = [#tpu.dimension_semantics<parallel>], iteration_bounds = array<i64: 1>, scalar_prefetch = 0 : i64, scratch_operands = 0 : i64, tpu.core_type = #tpu.core_type<tc>, window_params = [{transform_indices = @transform_0, window_bounds = array<i64: 2, 16, 64>}, {transform_indices = @transform_1, window_bounds = array<i64: 2, 128>}, {pipeline_mode = #tpu.pipeline_mode<synchronous>, transform_indices = @transform_2, window_bounds = array<i64: 64, 256>}, {pipeline_mode = #tpu.pipeline_mode<synchronous>, transform_indices = @transform_3, window_bounds = array<i64: 1, 256>}, {transform_indices = @transform_4, window_bounds = array<i64: 2, 16>}]} {
    %c0 = arith.constant 0 : index
    %c0_0 = arith.constant 0 : index
    %c0_1 = arith.constant 0 : index
    %0 = vector.load %arg1[%c0, %c0_0, %c0_1] : memref<2x16x64xf32, #tpu.memory_space<vmem>>, vector<2x16x64xf32>
    %1 = vector.shape_cast %0 : vector<2x16x64xf32> to vector<32x64xf32>
    %2 = arith.truncf %1 : vector<32x64xf32> to vector<32x64xbf16>
    %c0_2 = arith.constant 0 : index
    %c0_3 = arith.constant 0 : index
    %3 = vector.load %arg3[%c0_2, %c0_3] : memref<64x256xbf16, #tpu.memory_space<vmem>>, vector<64x256xbf16>
    %cst = arith.constant dense<0.000000e+00> : vector<32x256xf32>
    %4 = tpu.matmul %2, %3, %cst {dimension_numbers = #tpu.dot_dimension_numbers<[1], [0], [0], [1], [0, 0, 1, 1], [], []>} : vector<32x64xbf16>, vector<64x256xbf16>, vector<32x256xf32> -> vector<32x256xf32>
    %c0_4 = arith.constant 0 : index
    %c0_5 = arith.constant 0 : index
    %5 = vector.load %arg4[%c0_4, %c0_5] : memref<1x256xf32, #tpu.memory_space<vmem>>, vector<1x256xf32>
    %6 = vector.broadcast %5 : vector<1x256xf32> to vector<32x256xf32>
    %7 = arith.addf %4, %6 : vector<32x256xf32>
    %8 = vector.extract_strided_slice %7 {offsets = [0, 0], sizes = [32, 128], strides = [1, 1]} : vector<32x256xf32> to vector<32x128xf32>
    %9 = math.tanh %8 : vector<32x128xf32>
    %10 = vector.extract_strided_slice %7 {offsets = [0, 128], sizes = [32, 128], strides = [1, 1]} : vector<32x256xf32> to vector<32x128xf32>
    %11 = arith.negf %10 : vector<32x128xf32>
    %12 = math.exp %11 : vector<32x128xf32>
    %cst_6 = arith.constant 1.000000e+00 : f32
    %13 = vector.broadcast %cst_6 : f32 to vector<32x128xf32>
    %14 = arith.addf %13, %12 : vector<32x128xf32>
    %15 = arith.divf %13, %14 : vector<32x128xf32>
    %16 = arith.mulf %9, %15 : vector<32x128xf32>
    %17 = vector.shape_cast %16 : vector<32x128xf32> to vector<2x16x128xf32>
    %c0_7 = arith.constant 0 : index
    %c0_8 = arith.constant 0 : index
    %18 = vector.load %arg2[%c0_7, %c0_8] : memref<2x128xf32, #tpu.memory_space<vmem>>, vector<2x128xf32>
    %19 = vector.shape_cast %18 : vector<2x128xf32> to vector<2x1x128xf32>
    %20 = vector.broadcast %19 : vector<2x1x128xf32> to vector<2x16x128xf32>
    %21 = arith.mulf %17, %20 : vector<2x16x128xf32>
    %cst_9 = arith.constant dense<0.000000e+00> : vector<2x16xf32>
    %22 = vector.multi_reduction <add>, %21, %cst_9 [2] : vector<2x16x128xf32> to vector<2x16xf32>
    %cst_10 = arith.constant dense<0xFF800000> : vector<2xf32>
    %23 = vector.multi_reduction <maximumf>, %22, %cst_10 [1] : vector<2x16xf32> to vector<2xf32>
    %24 = vector.shape_cast %23 : vector<2xf32> to vector<2x1xf32>
    %25 = vector.broadcast %24 : vector<2x1xf32> to vector<2x16xf32>
    %26 = arith.subf %22, %25 : vector<2x16xf32>
    %27 = math.exp %26 : vector<2x16xf32>
    %cst_11 = arith.constant dense<0.000000e+00> : vector<2xf32>
    %28 = vector.multi_reduction <add>, %27, %cst_11 [1] : vector<2x16xf32> to vector<2xf32>
    %29 = vector.shape_cast %28 : vector<2xf32> to vector<2x1xf32>
    %30 = vector.broadcast %29 : vector<2x1xf32> to vector<2x16xf32>
    %31 = arith.divf %27, %30 : vector<2x16xf32>
    %c0_12 = arith.constant 0 : index
    %c0_13 = arith.constant 0 : index
    %32 = vector.load %arg5[%c0_12, %c0_13] : memref<2x16xf32, #tpu.memory_space<vmem>>, vector<2x16xf32>
    tpu.vector_store %arg5[%c0_12, %c0_13], %31 {strides = array<i32>} : memref<2x16xf32, #tpu.memory_space<vmem>>, vector<2x16xf32>,
    return
  }
  func.func @transform_0(%arg0: i32) -> (i32, i32, i32) {
    %c0_i32 = arith.constant 0 : i32
    %c0_i32_0 = arith.constant 0 : i32
    %c0_i32_1 = arith.constant 0 : i32
    return %arg0, %c0_i32, %c0_i32_0 : i32, i32, i32
  }
  func.func @transform_1(%arg0: i32) -> (i32, i32) {
    %c0_i32 = arith.constant 0 : i32
    %c0_i32_0 = arith.constant 0 : i32
    return %arg0, %c0_i32 : i32, i32
  }
  func.func @transform_2(%arg0: i32) -> (i32, i32) {
    %c0_i32 = arith.constant 0 : i32
    %c0_i32_0 = arith.constant 0 : i32
    %c0_i32_1 = arith.constant 0 : i32
    return %c0_i32, %c0_i32_0 : i32, i32
  }
  func.func @transform_3(%arg0: i32) -> (i32, i32) {
    %c0_i32 = arith.constant 0 : i32
    %c0_i32_0 = arith.constant 0 : i32
    %c0_i32_1 = arith.constant 0 : i32
    return %c0_i32, %c0_i32_0 : i32, i32
  }
  func.func @transform_4(%arg0: i32) -> (i32, i32) {
    %c0_i32 = arith.constant 0 : i32
    %c0_i32_0 = arith.constant 0 : i32
    return %arg0, %c0_i32 : i32, i32
  }
}

</mosaic_0001>

<bundles_post_ra>
// kernel: tpu_custom_call.1
= control target key start
LH: loop header
LB: loop body
LE: loop exit
PB: predicated region body
PF: predicated region fallthrough
CT: control target
= control target key end

     0   :  { %9 = vsyncpa [#allocation3], 0  ;;  %s691_s0 = inlined_call_operand.hbm [shape: f32[2,16,64], index: 0, kind: input, shape index: {}]   ;;  %s692_s1 = inlined_call_operand.hbm [shape: f32[2,128], index: 1, kind: input, shape index: {}]   ;;  %s693_s2 = inlined_call_operand.hbm [shape: bf16[64,256], index: 2, kind: input, shape index: {}]   ;;  %s694_s3 = inlined_call_operand.vmem [shape: f32[1,256], index: 3, kind: input, shape index: {}]   ;;  %s695_s4 = inlined_call_operand.hbm [shape: f32[2,16], index: 4, kind: output, shape index: {}]  }
   0x1   :  { %10 = vsyncpa [#allocation6], 0 }
   0x2   :  { %11 = vsyncpa [#allocation4], 0  ;;  %s594_s15 = smov [#allocation5]   ;;  %s595_s17 = smov [#allocation2]  }
   0x3   :  { %s30_s16 = sshll.u32 %s594_s15, 4  ;;  %s17_s18 = sshll.u32 %s595_s17, 4  ;;  %s31_s16 = int_to_ptr.vmem [resolvable:$true] %s30_s16  ;;  %s18_s18 = int_to_ptr.vmem [resolvable:$true] %s17_s18 }
   0x4   :  { %s516_s19 = scalar_lea.vmem %s31_s16, 32  ;;  %p521_p1 = scmp.lt.s32.totalorder %s31_s16, %s31_s16 }
   0x5   :  { %p517_p0 = scmp.ne.s32.totalorder %s31_s16, %s516_s19  ;;  %p522_p2 = scmp.lt.s32.totalorder %s516_s19, %s516_s19 }
   0x7   :  { %p523_p3 = por %p522_p2, %p521_p1 }
   0x9   :  { %p524_p4 = pnand %p523_p3, %p517_p0 }
   0xb   :  { %527 = shalt.err (!%p524_p4)
}
   0xc   :  { %33 = dma.hbm_to_vmem [thread:$0]  %s692_s1, 32, %s31_s16, [#allocation6]  }
   0xd   :  { %s536_s22 = scalar_lea.vmem %s18_s18, 512  ;;  %p541_p6 = scmp.lt.s32.totalorder %s18_s18, %s18_s18 }
   0xe   :  { %p537_p5 = scmp.ne.s32.totalorder %s18_s18, %s536_s22  ;;  %p542_p7 = scmp.lt.s32.totalorder %s536_s22, %s536_s22 }
  0x10   :  { %p543_p8 = por %p542_p7, %p541_p6 }
  0x12   :  { %p544_p9 = pnand %p543_p8, %p537_p5 }
  0x14   :  { %547 = shalt.err (!%p544_p9)
}
  0x15   :  { %s596_s23 = smov 128   ;;  %s597_s24 = smov 8  }
  0x16   :  { %23 = dma.hbm_to_vmem [thread:$0]  %s691_s0, 512, %s18_s18, [#allocation3], %s596_s23, %s596_s23, %s597_s24  }
  0x17   :  { %s598_s27 = smov [#allocation7]  }
  0x18   :  { %s39_s28 = sshll.u32 %s598_s27, 4  ;;  %s40_s28 = int_to_ptr.vmem [resolvable:$true] %s39_s28 }
  0x19   :  { %s556_s29 = scalar_lea.vmem %s40_s28, 1024  ;;  %p561_p11 = scmp.lt.s32.totalorder %s40_s28, %s40_s28 }
  0x1a   :  { %p557_p10 = scmp.ne.s32.totalorder %s40_s28, %s556_s29  ;;  %p562_p12 = scmp.lt.s32.totalorder %s556_s29, %s556_s29 }
  0x1c   :  { %p563_p13 = por %p562_p12, %p561_p11 }
  0x1e   :  { %p564_p0 = pnand %p563_p13, %p557_p10 }
  0x20   :  { %567 = shalt.err (!%p564_p0)
}
  0x21   :  { %45 = dma.hbm_to_vmem [thread:$0]  %s693_s2, 1024, %s40_s28, [#allocation6], %s596_s23, %s596_s23, %s597_s24  }
  0x22   :  { %588 = dma.done.wait [#allocation3], 512  }
  0x23   :  { %589 = vsyncadd [#allocation3], 4294966784 }
  0x24   :  { %590 = dma.done.wait [#allocation6], 1056  }
  0x25   :  { %591 = vsyncadd [#allocation6], 4294966240  ;;  %v599_v0 = vmov 0   ;;  %v460_v1 = vld [vmem:[#allocation7 + $0x34] ss:$8 sps:$4 sm:$0xff]   ;;  %v59_v10 = vld [vmem:[#allocation2 + $0x8] sm:$0xff]  ;;  %v74_v15 = vlaneseq }
  0x26   :  { %163 = vmatprep.mubr.bf16.mxu0 %v599_v0  ;;  %173 = vmatprep.mubr.bf16.mxu1 %v599_v0  ;;  %v462_v2 = vld [vmem:[#allocation7 + $0x30] ss:$8 sps:$4 sm:$0xff]   ;;  %v463_v3 = vld [vmem:[#allocation7 + $0x24] ss:$8 sps:$4 sm:$0xff]   ;;  %v465_v4 = vld [vmem:[#allocation7 + $0x20] ss:$8 sps:$4 sm:$0xff]  }
  0x27   :  { %459 = vset.pattern.permute.xlu0 %v599_v0  ;;  %458 = vset.pattern.permute.xlu1 %v599_v0  ;;  %v466_v5 = vld [vmem:[#allocation7 + $0x14] ss:$8 sps:$4 sm:$0xff]   ;;  %v468_v6 = vld [vmem:[#allocation7 + $0x10] ss:$8 sps:$4 sm:$0xff]   ;;  %v469_v7 = vld [vmem:[#allocation7 + $0x4] ss:$8 sps:$4 sm:$0xff]  }
  0x28   :  { %139 = vmatprep.subr.bf16.mxu0 %v460_v1  ;;  %442 = vmatprep.subr.bf16.mxu1 %v460_v1  ;;  %v471_v8 = vld [vmem:[#allocation7] ss:$8 sps:$4 sm:$0xff]   ;;  %v60_v11 = vld [vmem:[#allocation2 + $0x10] sm:$0xff]  ;;  %v61_v12 = vld [vmem:[#allocation2 + $0x18] sm:$0xff]  ;;  %vm124_vm0 = vcmask 523264   ;;  %v637_v16 = vshrl.u32 %v74_v15, 7 }
  0x29   :  { %140 = vmatpush1.bf16.msra.mxu0 %v462_v2  ;;  %446 = vmatpush1.bf16.msra.mxu1 %v462_v2  ;;  %v58_v9 = vld [vmem:[#allocation2] sm:$0xff]  ;;  %v63_v14 = vpack.c.bf16 %v61_v12, %v60_v11  ;;  %v600_v40 = vmov 1966171168   ;;  %v267_v12 = vand.u32 127, %v74_v15  ;;  %vm277_vm1 = vcmask 130112  }
  0x2a   :  { %141 = vmatprep.subr.bf16.mxu0 %v463_v3  ;;  %443 = vmatprep.subr.bf16.mxu1 %v463_v3  ;;  %v62_v13 = vpack.c.bf16 %v59_v10, %v58_v9  ;;  %v640_v17 = vsub.s32 1, %v637_v16  ;;  %v72_v18 = vld [vmem:[%s694_s3] sm:$0x3]  ;;  %v647_v34 = vsub.s32 0, %v637_v16  ;;  %v227_v41 = vunpack.c.l.s4 %v600_v40  ;;  %s601_s3 = smov [#allocation8]  }
  0x2b   :  { %v441_v52 = vld.sshfl [vmem:[#allocation5] sm:$0x11 pattern:$0x75316420]  ;;  %vm288_vm2 = vcmask 1041409   ;;  %vm291_vm3 = vcmask 123904  }
  0x2c   :  { %v81_v19 = vrot.slane %v72_v18, %v640_v17  ;;  %v77_v37 = vrot.slane %v72_v18, %v647_v34  ;;  %v228_v48 = vunpack.c.0.s8 %v227_v41  ;;  %v225_v55 = vcombine.high %v441_v52, %v441_v52  ;;  %s417_s5 = sshll.u32 %s601_s3, 4  ;;  %s418_s5 = int_to_ptr.vmem [resolvable:$true] %s417_s5 }
  0x2d   :  { %142 = vmatpush1.bf16.msra.mxu0 %v465_v4  ;;  %447 = vmatpush1.bf16.msra.mxu1 %v465_v4  ;;  %v655_v18 = vsub.s32 %v267_v12, %v637_v16  ;;  %s568_s6 = scalar_lea.vmem %s418_s5, 32  ;;  %p573_p2 = scmp.lt.s32.totalorder %s418_s5, %s418_s5 }
  0x2e   :  { %143 = vmatprep.subr.bf16.mxu0 %v466_v5  ;;  %444 = vmatprep.subr.bf16.mxu1 %v466_v5  ;;  %v231_v54 = vsub.s32 %v228_v48, %v637_v16  ;;  %p569_p1 = scmp.ne.s32.totalorder %s418_s5, %s568_s6  ;;  %p574_p3 = scmp.lt.s32.totalorder %s568_s6, %s568_s6 }
  0x30   :  { %v232_v56 = vrot.slane %v441_v52, %v231_v54  ;;  %v239_v57 = vrot.slane %v225_v55, %v231_v54  ;;  %p575_p4 = por %p574_p3, %p573_p2 }
  0x31   :  { %144 = vmatpush1.bf16.msra.mxu0 %v468_v6  ;;  %448 = vmatpush1.bf16.msra.mxu1 %v468_v6 }
  0x32   :  { %145 = vmatprep.subr.bf16.mxu0 %v469_v7  ;;  %445 = vmatprep.subr.bf16.mxu1 %v469_v7  ;;  %v243_v60 = vrot.slane %v232_v56, %v647_v34  ;;  %v247_v62 = vrot.slane %v239_v57, %v647_v34  ;;  %p576_p5 = pnand %p575_p4, %p569_p1 }
  0x35   :  { %146 = vmatpush1.bf16.msra.mxu0 %v471_v8  ;;  %449 = vmatpush1.bf16.msra.mxu1 %v471_v8 }
  0x38   :  { %435 = vmatmul.mubr.msk.bf16.vlgmr.msra.gmra.mxu0 %vm124_vm0, %v62_v13  ;;  %436 = vmatmul.mubr.msk.bf16.vlgmr.msra.gmra.mxu1 %vm124_vm0, %v63_v14  ;;  %v272_v13 = vadd.s32 4294967288, %v267_v12 }
  0xf8   :  { %v165_v20 = vpop.f32.mrf.mxu0  ;;  %v175_v21 = vpop.f32.mrf.mxu1 }
  0xf9   :  { %v166_v38 = vadd.f32 %v165_v20, %v77_v37  ;;  %v176_v39 = vadd.f32 %v175_v21, %v77_v37  ;;  %v658_v20 = vsub.s32 %v272_v13, %v637_v16 }
  0xfa   :  { %v167_v22 = vpop.f32.mrf.mxu0  ;;  %v177_v23 = vpop.f32.mrf.mxu1 }
  0xfb   :  { %v168_v24 = vadd.f32 %v167_v22, %v81_v19  ;;  %v178_v25 = vadd.f32 %v177_v23, %v81_v19 }
  0xfc   :  { %v169_v26 = vpop.f32.mrf.mxu0  ;;  %v179_v27 = vpop.f32.mrf.mxu1 }
  0xfd   :  { %v437_v28 = vmul.f32 -1.442695, %v168_v24  ;;  %v439_v29 = vmul.f32 -1.442695, %v178_v25  ;;  %v170_v45 = vadd.f32 %v169_v26, %v77_v37  ;;  %v180_v47 = vadd.f32 %v179_v27, %v77_v37 }
  0xfe   :  { %v171_v30 = vpop.f32.mrf.mxu0  ;;  %v181_v31 = vpop.f32.mrf.mxu1 }
  0xff   :  { %472 = vpow2.f32 %v437_v28  ;;  %v172_v32 = vadd.f32 %v171_v30, %v81_v19  ;;  %v182_v33 = vadd.f32 %v181_v31, %v81_v19 }
 0x100   :  { %474 = vpow2.f32 %v439_v29 }
 0x101   :  { %v438_v35 = vmul.f32 -1.442695, %v172_v32  ;;  %v440_v36 = vmul.f32 -1.442695, %v182_v33 }
 0x103   :  { %476 = vpow2.f32 %v438_v35 }
 0x104   :  { %478 = vpow2.f32 %v440_v36 }
 0x105   :  { %480 = vtanh.f32 %v166_v38 }
 0x106   :  { %482 = vtanh.f32 %v176_v39 }
 0x10c   :  { %v473_v42 = vpop.eup %472 }
 0x10d   :  { %v475_v43 = vpop.eup %474  ;;  %v200_v44 = vadd.f32 1.0, %v473_v42 }
 0x10e   :  { %v202_v46 = vadd.f32 1.0, %v475_v43 }
 0x10f   :  { %484 = vrcp.f32 %v200_v44 }
 0x110   :  { %v477_v49 = vpop.eup %476  ;;  %486 = vrcp.f32 %v202_v46 }
 0x111   :  { %v479_v50 = vpop.eup %478  ;;  %488 = vtanh.f32 %v170_v45  ;;  %v201_v51 = vadd.f32 1.0, %v477_v49 }
 0x112   :  { %490 = vtanh.f32 %v180_v47  ;;  %v203_v53 = vadd.f32 1.0, %v479_v50  ;;  %v481_v58 = vpop.eup %480 }
 0x113   :  { %492 = vrcp.f32 %v201_v51  ;;  %v483_v59 = vpop.eup %482 }
 0x114   :  { %494 = vrcp.f32 %v203_v53 }
 0x11c   :  { %v485_v61 = vpop.eup %484 }
 0x11d   :  { %v487_v63 = vpop.eup %486  ;;  %v212_v0 = vmul.f32 %v485_v61, %v481_v58 }
 0x11e   :  { %v489_v1 = vpop.eup %488  ;;  %v214_v2 = vmul.f32 %v487_v63, %v483_v59 }
 0x11f   :  { %v491_v3 = vpop.eup %490  ;;  %v250_v4 = vmul.f32 %v243_v60, %v212_v0 }
 0x120   :  { %v493_v5 = vpop.eup %492  ;;  %v252_v6 = vmul.f32 %v247_v62, %v214_v2 }
 0x121   :  { %v495_v7 = vpop.eup %494  ;;  %254 = vadd.xlane.f32.xlu0 %v250_v4  ;;  %v213_v8 = vmul.f32 %v493_v5, %v489_v1 }
 0x122   :  { %258 = vadd.xlane.f32.xlu1 %v252_v6  ;;  %v215_v9 = vmul.f32 %v495_v7, %v491_v3 }
 0x123   :  { %v251_v10 = vmul.f32 %v243_v60, %v213_v8 }
 0x124   :  { %v253_v11 = vmul.f32 %v247_v62, %v215_v9 }
 0x125   :  { %256 = vadd.xlane.f32.xlu0 %v251_v10 }
 0x126   :  { %260 = vadd.xlane.f32.xlu1 %v253_v11 }
 0x1aa   :  { %v255_v14 = vpop.xlane.xlu0 %254 }
 0x1ab   :  { %v259_v19 = vpop.xlane.xlu1 %258  ;;  %v271_v22 = vrot.slane %v255_v14, %v655_v18 }
 0x1ac   :  { %v282_v25 = vrot.slane %v259_v19, %v655_v18 }
 0x1ae   :  { %v257_v21 = vpop.xlane.xlu0 %256 }
 0x1af   :  { %v261_v23 = vpop.xlane.xlu1 %260  ;;  %v276_v24 = vrot.slane %v257_v21, %v658_v20 }
 0x1b0   :  { %v286_v15 = vrot.slane %v261_v23, %v658_v20 }
 0x1b1   :  { %v278_v26 = vsel %vm277_vm1, %v276_v24, %v271_v22 }
 0x1b2   :  { %v287_v27 = vsel %vm277_vm1, %v286_v15, %v282_v25 }
 0x1b3   :  { %v289_v16 = vsel %vm288_vm2, %v287_v27, %v278_v26 }
 0x1b4   :  { %v292_v28 = vsel %vm291_vm3, %v289_v16, -inf }
 0x1b5   :  { %293 = vmax.xlane.f32.xlu0 %v292_v28 }
 0x23e   :  { %v294_v29 = vpop.xlane.xlu0 %293 }
 0x23f   :  { %v299_v30 = vrot.slane %v294_v29, %v647_v34  ;;  %v303_v31 = vrot.slane %v294_v29, %v640_v17 }
 0x241   :  { %v306_v32 = vsub.f32 %v255_v14, %v299_v30  ;;  %v307_v33 = vsub.f32 %v257_v21, %v299_v30  ;;  %v308_v35 = vsub.f32 %v259_v19, %v303_v31  ;;  %v309_v38 = vsub.f32 %v261_v23, %v303_v31 }
 0x243   :  { %v310_v36 = vmul.f32 1.442695, %v306_v32  ;;  %v312_v37 = vmul.f32 1.442695, %v307_v33  ;;  %v314_v39 = vmul.f32 1.442695, %v308_v35 }
 0x244   :  { %v316_v40 = vmul.f32 1.442695, %v309_v38 }
 0x245   :  { %496 = vpow2.f32 %v310_v36 }
 0x246   :  { %498 = vpow2.f32 %v312_v37 }
 0x247   :  { %500 = vpow2.f32 %v314_v39 }
 0x248   :  { %502 = vpow2.f32 %v316_v40 }
 0x252   :  { %v497_v41 = vpop.eup %496 }
 0x253   :  { %v499_v42 = vpop.eup %498  ;;  %323 = vperm.xlu1 %458, %v497_v41  }
 0x254   :  { %326 = vperm.xlu0 %459, %v499_v42   ;;  %v501_v43 = vpop.eup %500 }
 0x255   :  { %v503_v44 = vpop.eup %502 }
 0x257   :  { %329 = vperm.xlu1 %458, %v501_v43  }
 0x25b   :  { %332 = vperm.xlu1 %458, %v503_v44  }
 0x2ce   :  { %v324_v45 = vpop.permute.xlu1 %323 }
 0x2cf   :  { %v327_v46 = vpop.permute.xlu0 %326  ;;  %v337_v49 = vrot.slane %v324_v45, %v655_v18 }
 0x2d0   :  { %v341_v48 = vrot.slane %v327_v46, %v658_v20 }
 0x2d2   :  { %v330_v47 = vpop.permute.xlu1 %329  ;;  %v342_v53 = vsel %vm277_vm1, %v341_v48, %v337_v49 }
 0x2d3   :  { %v346_v51 = vrot.slane %v330_v47, %v655_v18 }
 0x2d6   :  { %v333_v50 = vpop.permute.xlu1 %332 }
 0x2d7   :  { %v350_v52 = vrot.slane %v333_v50, %v658_v20 }
 0x2d9   :  { %v351_v54 = vsel %vm277_vm1, %v350_v52, %v346_v51 }
 0x2da   :  { %v352_v55 = vsel %vm288_vm2, %v351_v54, %v342_v53 }
 0x2db   :  { %v354_v56 = vsel %vm291_vm3, %v352_v55, 0.0 }
 0x2dc   :  { %355 = vadd.xlane.f32.xlu1 %v354_v56 }
 0x365   :  { %v356_v57 = vpop.xlane.xlu1 %355 }
 0x366   :  { %v361_v58 = vrot.slane %v356_v57, %v647_v34  ;;  %v365_v59 = vrot.slane %v356_v57, %v640_v17 }
 0x368   :  { %504 = vrcp.f32 %v361_v58 }
 0x369   :  { %506 = vrcp.f32 %v365_v59 }
 0x375   :  { %v505_v60 = vpop.eup %504 }
 0x376   :  { %v369_v61 = vmul.f32 %v505_v60, %v497_v41  ;;  %v370_v62 = vmul.f32 %v505_v60, %v499_v42  ;;  %v507_v63 = vpop.eup %506 }
 0x377   :  { %v372_v0 = vmul.f32 %v507_v63, %v501_v43  ;;  %v373_v1 = vmul.f32 %v507_v63, %v503_v44 }
 0x378   :  { %379 = vperm.xlu0 %459, %v369_v61  }
 0x37c   :  { %382 = vperm.xlu0 %459, %v370_v62  }
 0x380   :  { %385 = vperm.xlu0 %459, %v372_v0  }
 0x384   :  { %388 = vperm.xlu0 %459, %v373_v1  }
 0x3f3   :  { %v380_v2 = vpop.permute.xlu0 %379 }
 0x3f4   :  { %v393_v17 = vrot.slane %v380_v2, %v655_v18 }
 0x3f7   :  { %v383_v3 = vpop.permute.xlu0 %382 }
 0x3f8   :  { %v397_v5 = vrot.slane %v383_v3, %v658_v20 }
 0x3fa   :  { %v398_v8 = vsel %vm277_vm1, %v397_v5, %v393_v17 }
 0x3fb   :  { %v386_v4 = vpop.permute.xlu0 %385 }
 0x3fc   :  { %v402_v6 = vrot.slane %v386_v4, %v655_v18 }
 0x3ff   :  { %v389_v34 = vpop.permute.xlu0 %388 }
 0x400   :  { %v406_v7 = vrot.slane %v389_v34, %v658_v20 }
 0x402   :  { %v407_v9 = vsel %vm277_vm1, %v406_v7, %v402_v6 }
 0x403   :  { %v408_v10 = vsel %vm288_vm2, %v407_v9, %v398_v8 }
 0x404   :  { %410 = vst.msk [vmem:[#allocation8] sm:$0x3] %vm291_vm3, %v408_v10 }
 0x405   :  { %579 = shalt.err (!%p576_p5)
}
 0x406   :  { %420 = dma.vmem_to_hbm [thread:$0]  %s418_s5, 32, %s695_s4, [#allocation4]  }
 0x407   :  { %592 = dma.done.wait [#allocation4], 32  }
 0x408   :  { %593 = vsyncadd [#allocation4], 4294967264 }
 0x409   :  { %424 = vsyncpa [#allocation3], 1 }
 0x40a   :  { %425 = vsyncpa [#allocation6], 1 }
 0x40b   :  { %426 = vsyncpa [#allocation4], 1 }

// kernel: tpu_custom_call.1
= control target key start
LH: loop header
LB: loop body
LE: loop exit
PB: predicated region body
PF: predicated region fallthrough
CT: control target
= control target key end

     0   :  { %9 = vsyncpa [#allocation3], 0  ;;  %s691_s0 = inlined_call_operand.hbm [shape: f32[2,16,64], index: 0, kind: input, shape index: {}]   ;;  %s692_s1 = inlined_call_operand.hbm [shape: f32[2,128], index: 1, kind: input, shape index: {}]   ;;  %s693_s2 = inlined_call_operand.hbm [shape: bf16[64,256], index: 2, kind: input, shape index: {}]   ;;  %s694_s3 = inlined_call_operand.vmem [shape: f32[1,256], index: 3, kind: input, shape index: {}]   ;;  %s695_s4 = inlined_call_operand.hbm [shape: f32[2,16], index: 4, kind: output, shape index: {}]  }
   0x1   :  { %10 = vsyncpa [#allocation6], 0 }
   0x2   :  { %11 = vsyncpa [#allocation4], 0  ;;  %s594_s15 = smov [#allocation5]   ;;  %s595_s17 = smov [#allocation2]  }
   0x3   :  { %s30_s16 = sshll.u32 %s594_s15, 4  ;;  %s17_s18 = sshll.u32 %s595_s17, 4  ;;  %s31_s16 = int_to_ptr.vmem [resolvable:$true] %s30_s16  ;;  %s18_s18 = int_to_ptr.vmem [resolvable:$true] %s17_s18 }
   0x4   :  { %s516_s19 = scalar_lea.vmem %s31_s16, 32  ;;  %p521_p1 = scmp.lt.s32.totalorder %s31_s16, %s31_s16 }
   0x5   :  { %p517_p0 = scmp.ne.s32.totalorder %s31_s16, %s516_s19  ;;  %p522_p2 = scmp.lt.s32.totalorder %s516_s19, %s516_s19 }
   0x7   :  { %p523_p3 = por %p522_p2, %p521_p1 }
   0x9   :  { %p524_p4 = pnand %p523_p3, %p517_p0 }
   0xb   :  { %527 = shalt.err (!%p524_p4)
}
   0xc   :  { %33 = dma.hbm_to_vmem [thread:$0]  %s692_s1, 32, %s31_s16, [#allocation6]  }
   0xd   :  { %s536_s22 = scalar_lea.vmem %s18_s18, 512  ;;  %p541_p6 = scmp.lt.s32.totalorder %s18_s18, %s18_s18 }
   0xe   :  { %p537_p5 = scmp.ne.s32.totalorder %s18_s18, %s536_s22  ;;  %p542_p7 = scmp.lt.s32.totalorder %s536_s22, %s536_s22 }
  0x10   :  { %p543_p8 = por %p542_p7, %p541_p6 }
  0x12   :  { %p544_p9 = pnand %p543_p8, %p537_p5 }
  0x14   :  { %547 = shalt.err (!%p544_p9)
}
  0x15   :  { %s596_s23 = smov 128   ;;  %s597_s24 = smov 8  }
  0x16   :  { %23 = dma.hbm_to_vmem [thread:$0]  %s691_s0, 512, %s18_s18, [#allocation3], %s596_s23, %s596_s23, %s597_s24  }
  0x17   :  { %s598_s27 = smov [#allocation7]  }
  0x18   :  { %s39_s28 = sshll.u32 %s598_s27, 4  ;;  %s40_s28 = int_to_ptr.vmem [resolvable:$true] %s39_s28 }
  0x19   :  { %s556_s29 = scalar_lea.vmem %s40_s28, 1024  ;;  %p561_p11 = scmp.lt.s32.totalorder %s40_s28, %s40_s28 }
  0x1a   :  { %p557_p10 = scmp.ne.s32.totalorder %s40_s28, %s556_s29  ;;  %p562_p12 = scmp.lt.s32.totalorder %s556_s29, %s556_s29 }
  0x1c   :  { %p563_p13 = por %p562_p12, %p561_p11 }
  0x1e   :  { %p564_p0 = pnand %p563_p13, %p557_p10 }
  0x20   :  { %567 = shalt.err (!%p564_p0)
}
  0x21   :  { %45 = dma.hbm_to_vmem [thread:$0]  %s693_s2, 1024, %s40_s28, [#allocation6], %s596_s23, %s596_s23, %s597_s24  }
  0x22   :  { %588 = dma.done.wait [#allocation3], 512  }
  0x23   :  { %589 = vsyncadd [#allocation3], 4294966784 }
  0x24   :  { %590 = dma.done.wait [#allocation6], 1056  }
  0x25   :  { %591 = vsyncadd [#allocation6], 4294966240  ;;  %v599_v0 = vmov 0   ;;  %v460_v1 = vld [vmem:[#allocation7 + $0x34] ss:$8 sps:$4 sm:$0xff]   ;;  %v59_v10 = vld [vmem:[#allocation2 + $0x8] sm:$0xff]  ;;  %v74_v15 = vlaneseq }
  0x26   :  { %163 = vmatprep.mubr.bf16.mxu0 %v599_v0  ;;  %173 = vmatprep.mubr.bf16.mxu1 %v599_v0  ;;  %v462_v2 = vld [vmem:[#allocation7 + $0x30] ss:$8 sps:$4 sm:$0xff]   ;;  %v463_v3 = vld [vmem:[#allocation7 + $0x24] ss:$8 sps:$4 sm:$0xff]   ;;  %v465_v4 = vld [vmem:[#allocation7 + $0x20] ss:$8 sps:$4 sm:$0xff]  }
  0x27   :  { %459 = vset.pattern.permute.xlu0 %v599_v0  ;;  %458 = vset.pattern.permute.xlu1 %v599_v0  ;;  %v466_v5 = vld [vmem:[#allocation7 + $0x14] ss:$8 sps:$4 sm:$0xff]   ;;  %v468_v6 = vld [vmem:[#allocation7 + $0x10] ss:$8 sps:$4 sm:$0xff]   ;;  %v469_v7 = vld [vmem:[#allocation7 + $0x4] ss:$8 sps:$4 sm:$0xff]  }
  0x28   :  { %139 = vmatprep.subr.bf16.mxu0 %v460_v1  ;;  %442 = vmatprep.subr.bf16.mxu1 %v460_v1  ;;  %v471_v8 = vld [vmem:[#allocation7] ss:$8 sps:$4 sm:$0xff]   ;;  %v60_v11 = vld [vmem:[#allocation2 + $0x10] sm:$0xff]  ;;  %v61_v12 = vld [vmem:[#allocation2 + $0x18] sm:$0xff]  ;;  %vm124_vm0 = vcmask 523264   ;;  %v637_v16 = vshrl.u32 %v74_v15, 7 }
  0x29   :  { %140 = vmatpush1.bf16.msra.mxu0 %v462_v2  ;;  %446 = vmatpush1.bf16.msra.mxu1 %v462_v2  ;;  %v58_v9 = vld [vmem:[#allocation2] sm:$0xff]  ;;  %v63_v14 = vpack.c.bf16 %v61_v12, %v60_v11  ;;  %v600_v40 = vmov 1966171168   ;;  %v267_v12 = vand.u32 127, %v74_v15  ;;  %vm277_vm1 = vcmask 130112  }
  0x2a   :  { %141 = vmatprep.subr.bf16.mxu0 %v463_v3  ;;  %443 = vmatprep.subr.bf16.mxu1 %v463_v3  ;;  %v62_v13 = vpack.c.bf16 %v59_v10, %v58_v9  ;;  %v640_v17 = vsub.s32 1, %v637_v16  ;;  %v72_v18 = vld [vmem:[%s694_s3] sm:$0x3]  ;;  %v647_v34 = vsub.s32 0, %v637_v16  ;;  %v227_v41 = vunpack.c.l.s4 %v600_v40  ;;  %s601_s3 = smov [#allocation8]  }
  0x2b   :  { %v441_v52 = vld.sshfl [vmem:[#allocation5] sm:$0x11 pattern:$0x75316420]  ;;  %vm288_vm2 = vcmask 1041409   ;;  %vm291_vm3 = vcmask 123904  }
  0x2c   :  { %v81_v19 = vrot.slane %v72_v18, %v640_v17  ;;  %v77_v37 = vrot.slane %v72_v18, %v647_v34  ;;  %v228_v48 = vunpack.c.0.s8 %v227_v41  ;;  %v225_v55 = vcombine.high %v441_v52, %v441_v52  ;;  %s417_s5 = sshll.u32 %s601_s3, 4  ;;  %s418_s5 = int_to_ptr.vmem [resolvable:$true] %s417_s5 }
  0x2d   :  { %142 = vmatpush1.bf16.msra.mxu0 %v465_v4  ;;  %447 = vmatpush1.bf16.msra.mxu1 %v465_v4  ;;  %v655_v18 = vsub.s32 %v267_v12, %v637_v16  ;;  %s568_s6 = scalar_lea.vmem %s418_s5, 32  ;;  %p573_p2 = scmp.lt.s32.totalorder %s418_s5, %s418_s5 }
  0x2e   :  { %143 = vmatprep.subr.bf16.mxu0 %v466_v5  ;;  %444 = vmatprep.subr.bf16.mxu1 %v466_v5  ;;  %v231_v54 = vsub.s32 %v228_v48, %v637_v16  ;;  %p569_p1 = scmp.ne.s32.totalorder %s418_s5, %s568_s6  ;;  %p574_p3 = scmp.lt.s32.totalorder %s568_s6, %s568_s6 }
  0x30   :  { %v232_v56 = vrot.slane %v441_v52, %v231_v54  ;;  %v239_v57 = vrot.slane %v225_v55, %v231_v54  ;;  %p575_p4 = por %p574_p3, %p573_p2 }
  0x31   :  { %144 = vmatpush1.bf16.msra.mxu0 %v468_v6  ;;  %448 = vmatpush1.bf16.msra.mxu1 %v468_v6 }
  0x32   :  { %145 = vmatprep.subr.bf16.mxu0 %v469_v7  ;;  %445 = vmatprep.subr.bf16.mxu1 %v469_v7  ;;  %v243_v60 = vrot.slane %v232_v56, %v647_v34  ;;  %v247_v62 = vrot.slane %v239_v57, %v647_v34  ;;  %p576_p5 = pnand %p575_p4, %p569_p1 }
  0x35   :  { %146 = vmatpush1.bf16.msra.mxu0 %v471_v8  ;;  %449 = vmatpush1.bf16.msra.mxu1 %v471_v8 }
  0x38   :  { %435 = vmatmul.mubr.msk.bf16.vlgmr.msra.gmra.mxu0 %vm124_vm0, %v62_v13  ;;  %436 = vmatmul.mubr.msk.bf16.vlgmr.msra.gmra.mxu1 %vm124_vm0, %v63_v14  ;;  %v272_v13 = vadd.s32 4294967288, %v267_v12 }
  0xf8   :  { %v165_v20 = vpop.f32.mrf.mxu0  ;;  %v175_v21 = vpop.f32.mrf.mxu1 }
  0xf9   :  { %v166_v38 = vadd.f32 %v165_v20, %v77_v37  ;;  %v176_v39 = vadd.f32 %v175_v21, %v77_v37  ;;  %v658_v20 = vsub.s32 %v272_v13, %v637_v16 }
  0xfa   :  { %v167_v22 = vpop.f32.mrf.mxu0  ;;  %v177_v23 = vpop.f32.mrf.mxu1 }
  0xfb   :  { %v168_v24 = vadd.f32 %v167_v22, %v81_v19  ;;  %v178_v25 = vadd.f32 %v177_v23, %v81_v19 }
  0xfc   :  { %v169_v26 = vpop.f32.mrf.mxu0  ;;  %v179_v27 = vpop.f32.mrf.mxu1 }
  0xfd   :  { %v437_v28 = vmul.f32 -1.442695, %v168_v24  ;;  %v439_v29 = vmul.f32 -1.442695, %v178_v25  ;;  %v170_v45 = vadd.f32 %v169_v26, %v77_v37  ;;  %v180_v47 = vadd.f32 %v179_v27, %v77_v37 }
  0xfe   :  { %v171_v30 = vpop.f32.mrf.mxu0  ;;  %v181_v31 = vpop.f32.mrf.mxu1 }
  0xff   :  { %472 = vpow2.f32 %v437_v28  ;;  %v172_v32 = vadd.f32 %v171_v30, %v81_v19  ;;  %v182_v33 = vadd.f32 %v181_v31, %v81_v19 }
 0x100   :  { %474 = vpow2.f32 %v439_v29 }
 0x101   :  { %v438_v35 = vmul.f32 -1.442695, %v172_v32  ;;  %v440_v36 = vmul.f32 -1.442695, %v182_v33 }
 0x103   :  { %476 = vpow2.f32 %v438_v35 }
 0x104   :  { %478 = vpow2.f32 %v440_v36 }
 0x105   :  { %480 = vtanh.f32 %v166_v38 }
 0x106   :  { %482 = vtanh.f32 %v176_v39 }
 0x10c   :  { %v473_v42 = vpop.eup %472 }
 0x10d   :  { %v475_v43 = vpop.eup %474  ;;  %v200_v44 = vadd.f32 1.0, %v473_v42 }
 0x10e   :  { %v202_v46 = vadd.f32 1.0, %v475_v43 }
 0x10f   :  { %484 = vrcp.f32 %v200_v44 }
 0x110   :  { %v477_v49 = vpop.eup %476  ;;  %486 = vrcp.f32 %v202_v46 }
 0x111   :  { %v479_v50 = vpop.eup %478  ;;  %488 = vtanh.f32 %v170_v45  ;;  %v201_v51 = vadd.f32 1.0, %v477_v49 }
 0x112   :  { %490 = vtanh.f32 %v180_v47  ;;  %v203_v53 = vadd.f32 1.0, %v479_v50  ;;  %v481_v58 = vpop.eup %480 }
 0x113   :  { %492 = vrcp.f32 %v201_v51  ;;  %v483_v59 = vpop.eup %482 }
 0x114   :  { %494 = vrcp.f32 %v203_v53 }
 0x11c   :  { %v485_v61 = vpop.eup %484 }
 0x11d   :  { %v487_v63 = vpop.eup %486  ;;  %v212_v0 = vmul.f32 %v485_v61, %v481_v58 }
 0x11e   :  { %v489_v1 = vpop.eup %488  ;;  %v214_v2 = vmul.f32 %v487_v63, %v483_v59 }
 0x11f   :  { %v491_v3 = vpop.eup %490  ;;  %v250_v4 = vmul.f32 %v243_v60, %v212_v0 }
 0x120   :  { %v493_v5 = vpop.eup %492  ;;  %v252_v6 = vmul.f32 %v247_v62, %v214_v2 }
 0x121   :  { %v495_v7 = vpop.eup %494  ;;  %254 = vadd.xlane.f32.xlu0 %v250_v4  ;;  %v213_v8 = vmul.f32 %v493_v5, %v489_v1 }
 0x122   :  { %258 = vadd.xlane.f32.xlu1 %v252_v6  ;;  %v215_v9 = vmul.f32 %v495_v7, %v491_v3 }
 0x123   :  { %v251_v10 = vmul.f32 %v243_v60, %v213_v8 }
 0x124   :  { %v253_v11 = vmul.f32 %v247_v62, %v215_v9 }
 0x125   :  { %256 = vadd.xlane.f32.xlu0 %v251_v10 }
 0x126   :  { %260 = vadd.xlane.f32.xlu1 %v253_v11 }
 0x1aa   :  { %v255_v14 = vpop.xlane.xlu0 %254 }
 0x1ab   :  { %v259_v19 = vpop.xlane.xlu1 %258  ;;  %v271_v22 = vrot.slane %v255_v14, %v655_v18 }
 0x1ac   :  { %v282_v25 = vrot.slane %v259_v19, %v655_v18 }
 0x1ae   :  { %v257_v21 = vpop.xlane.xlu0 %256 }
 0x1af   :  { %v261_v23 = vpop.xlane.xlu1 %260  ;;  %v276_v24 = vrot.slane %v257_v21, %v658_v20 }
 0x1b0   :  { %v286_v15 = vrot.slane %v261_v23, %v658_v20 }
 0x1b1   :  { %v278_v26 = vsel %vm277_vm1, %v276_v24, %v271_v22 }
 0x1b2   :  { %v287_v27 = vsel %vm277_vm1, %v286_v15, %v282_v25 }
 0x1b3   :  { %v289_v16 = vsel %vm288_vm2, %v287_v27, %v278_v26 }
 0x1b4   :  { %v292_v28 = vsel %vm291_vm3, %v289_v16, -inf }
 0x1b5   :  { %293 = vmax.xlane.f32.xlu0 %v292_v28 }
 0x23e   :  { %v294_v29 = vpop.xlane.xlu0 %293 }
 0x23f   :  { %v299_v30 = vrot.slane %v294_v29, %v647_v34  ;;  %v303_v31 = vrot.slane %v294_v29, %v640_v17 }
 0x241   :  { %v306_v32 = vsub.f32 %v255_v14, %v299_v30  ;;  %v307_v33 = vsub.f32 %v257_v21, %v299_v30  ;;  %v308_v35 = vsub.f32 %v259_v19, %v303_v31  ;;  %v309_v38 = vsub.f32 %v261_v23, %v303_v31 }
 0x243   :  { %v310_v36 = vmul.f32 1.442695, %v306_v32  ;;  %v312_v37 = vmul.f32 1.442695, %v307_v33  ;;  %v314_v39 = vmul.f32 1.442695, %v308_v35 }
 0x244   :  { %v316_v40 = vmul.f32 1.442695, %v309_v38 }
 0x245   :  { %496 = vpow2.f32 %v310_v36 }
 0x246   :  { %498 = vpow2.f32 %v312_v37 }
 0x247   :  { %500 = vpow2.f32 %v314_v39 }
 0x248   :  { %502 = vpow2.f32 %v316_v40 }
 0x252   :  { %v497_v41 = vpop.eup %496 }
 0x253   :  { %v499_v42 = vpop.eup %498  ;;  %323 = vperm.xlu1 %458, %v497_v41  }
 0x254   :  { %326 = vperm.xlu0 %459, %v499_v42   ;;  %v501_v43 = vpop.eup %500 }
 0x255   :  { %v503_v44 = vpop.eup %502 }
 0x257   :  { %329 = vperm.xlu1 %458, %v501_v43  }
 0x25b   :  { %332 = vperm.xlu1 %458, %v503_v44  }
 0x2ce   :  { %v324_v45 = vpop.permute.xlu1 %323 }
 0x2cf   :  { %v327_v46 = vpop.permute.xlu0 %326  ;;  %v337_v49 = vrot.slane %v324_v45, %v655_v18 }
 0x2d0   :  { %v341_v48 = vrot.slane %v327_v46, %v658_v20 }
 0x2d2   :  { %v330_v47 = vpop.permute.xlu1 %329  ;;  %v342_v53 = vsel %vm277_vm1, %v341_v48, %v337_v49 }
 0x2d3   :  { %v346_v51 = vrot.slane %v330_v47, %v655_v18 }
 0x2d6   :  { %v333_v50 = vpop.permute.xlu1 %332 }
 0x2d7   :  { %v350_v52 = vrot.slane %v333_v50, %v658_v20 }
 0x2d9   :  { %v351_v54 = vsel %vm277_vm1, %v350_v52, %v346_v51 }
 0x2da   :  { %v352_v55 = vsel %vm288_vm2, %v351_v54, %v342_v53 }
 0x2db   :  { %v354_v56 = vsel %vm291_vm3, %v352_v55, 0.0 }
 0x2dc   :  { %355 = vadd.xlane.f32.xlu1 %v354_v56 }
 0x365   :  { %v356_v57 = vpop.xlane.xlu1 %355 }
 0x366   :  { %v361_v58 = vrot.slane %v356_v57, %v647_v34  ;;  %v365_v59 = vrot.slane %v356_v57, %v640_v17 }
 0x368   :  { %504 = vrcp.f32 %v361_v58 }
 0x369   :  { %506 = vrcp.f32 %v365_v59 }
 0x375   :  { %v505_v60 = vpop.eup %504 }
 0x376   :  { %v369_v61 = vmul.f32 %v505_v60, %v497_v41  ;;  %v370_v62 = vmul.f32 %v505_v60, %v499_v42  ;;  %v507_v63 = vpop.eup %506 }
 0x377   :  { %v372_v0 = vmul.f32 %v507_v63, %v501_v43  ;;  %v373_v1 = vmul.f32 %v507_v63, %v503_v44 }
 0x378   :  { %379 = vperm.xlu0 %459, %v369_v61  }
 0x37c   :  { %382 = vperm.xlu0 %459, %v370_v62  }
 0x380   :  { %385 = vperm.xlu0 %459, %v372_v0  }
 0x384   :  { %388 = vperm.xlu0 %459, %v373_v1  }
 0x3f3   :  { %v380_v2 = vpop.permute.xlu0 %379 }
 0x3f4   :  { %v393_v17 = vrot.slane %v380_v2, %v655_v18 }
 0x3f7   :  { %v383_v3 = vpop.permute.xlu0 %382 }
 0x3f8   :  { %v397_v5 = vrot.slane %v383_v3, %v658_v20 }
 0x3fa   :  { %v398_v8 = vsel %vm277_vm1, %v397_v5, %v393_v17 }
 0x3fb   :  { %v386_v4 = vpop.permute.xlu0 %385 }
 0x3fc   :  { %v402_v6 = vrot.slane %v386_v4, %v655_v18 }
 0x3ff   :  { %v389_v34 = vpop.permute.xlu0 %388 }
 0x400   :  { %v406_v7 = vrot.slane %v389_v34, %v658_v20 }
 0x402   :  { %v407_v9 = vsel %vm277_vm1, %v406_v7, %v402_v6 }
 0x403   :  { %v408_v10 = vsel %vm288_vm2, %v407_v9, %v398_v8 }
 0x404   :  { %410 = vst.msk [vmem:[#allocation8] sm:$0x3] %vm291_vm3, %v408_v10 }
 0x405   :  { %579 = shalt.err (!%p576_p5)
}
 0x406   :  { %420 = dma.vmem_to_hbm [thread:$0]  %s418_s5, 32, %s695_s4, [#allocation4]  }
 0x407   :  { %592 = dma.done.wait [#allocation4], 32  }
 0x408   :  { %593 = vsyncadd [#allocation4], 4294967264 }
 0x409   :  { %424 = vsyncpa [#allocation3], 1 }
 0x40a   :  { %425 = vsyncpa [#allocation6], 1 }
 0x40b   :  { %426 = vsyncpa [#allocation4], 1 }

</bundles_post_ra>
